<compile_context>
chip_gen: v5e
topology: v5e:2x2
jax: 0.10.0
libtpu: 0.0.40
codegen_flags: <defaults>
</compile_context>

<pallas_src>
import functools

import jax
import jax.numpy as jnp
from jax.experimental import pallas as pl
from jax.experimental.pallas import tpu as pltpu

_SUBLANE_BF16 = 16  # bf16 packs 16 sublanes per vreg


def _round_up(v, m):
    return ((v + m - 1) // m) * m


def _mlp_kernel(x_ref, w1_ref, b1_ref, w2_ref, b2_ref, w3_ref, b3_ref, o_ref):
    # Compute dtype for matmul operands follows the weight dtype (bf16 or f32);
    # accumulation is always f32 on the MXU, bias + ReLU are done in f32.
    cdt = w1_ref.dtype
    x = x_ref[...].astype(cdt)
    # Layer 1: Linear + ReLU.
    h = jnp.dot(x, w1_ref[...], preferred_element_type=jnp.float32)
    h = jnp.maximum(h + b1_ref[...], 0.0)
    # Layer 2: Linear + ReLU.
    h = jnp.dot(h.astype(cdt), w2_ref[...], preferred_element_type=jnp.float32)
    h = jnp.maximum(h + b2_ref[...], 0.0)
    # Layer 3: Linear (no activation). Output block last dim equals the full
    # latent dim (32), so no lane padding / post-slice is needed.
    out = jnp.dot(h.astype(cdt), w3_ref[...], preferred_element_type=jnp.float32)
    out = out + b3_ref[...]
    o_ref[...] = out.astype(o_ref.dtype)


@functools.partial(jax.jit, static_argnames=("tile_b", "use_bf16"))
def visual_goal_encoder(x, w1, b1, w2, b2, w3, b3, *, tile_b=None, use_bf16=True):
    B, in_f = x.shape
    hid = w1.shape[1]
    lat = w3.shape[1]

    # ---- compute dtype ------------------------------------------------------
    if use_bf16:
        w1c = w1.astype(jnp.bfloat16)
        w2c = w2.astype(jnp.bfloat16)
        w3c = w3.astype(jnp.bfloat16)
        w_itemsize = 2
    else:
        w1c, w2c, w3c = w1, w2, w3
        w_itemsize = jnp.dtype(w1.dtype).itemsize
    x_itemsize = jnp.dtype(x.dtype).itemsize

    # ---- VMEM limit / tile budget from the hardware -------------------------
    try:
        vmem_cap = int(pltpu.get_tpu_info().vmem_capacity_bytes)
    except Exception:
        vmem_cap = 64 * 1024 * 1024  # safe for every generation (v7x = 64 MiB)
    vmem_limit = min((vmem_cap * 3) // 4, 100 * 1024 * 1024)
    budget = (vmem_limit * 3) // 4  # headroom for internal scratch

    # Best-effort TensorCore count (only used to decide whether splitting a
    # single fat tile into per-core tiles is worth it; default = no split).
    try:
        _info = pltpu.get_tpu_info()
        num_cores = int(getattr(_info, "num_cores",
                                getattr(_info, "tensor_cores", 1)) or 1)
    except Exception:
        num_cores = 1

    # ---- choose the batch tile against the VMEM budget ----------------------
    # Weights/biases are double-buffered by the default pipeline; x/out tiles
    # are double-buffered; ~3 hidden-sized f32 activations live in the body.
    weight_bytes = 2 * (w_itemsize * (in_f * hid + hid * hid + hid * lat)
                        + 4 * (2 * hid + lat))
    per_row_bytes = (2 * in_f * x_itemsize      # x tile (double-buffered)
                     + 2 * lat * x_itemsize     # out tile (double-buffered)
                     + 3 * hid * 4)             # live f32/bf16 activations
    avail = max(budget - weight_bytes, 512 * 1024)
    max_rows = max(_SUBLANE_BF16,
                   (avail // per_row_bytes) // _SUBLANE_BF16 * _SUBLANE_BF16)

    if tile_b is None:
        tile_b = 8192
    tile_b = min(int(tile_b), max_rows, _round_up(B, _SUBLANE_BF16))
    tile_b = max(_SUBLANE_BF16, _round_up(tile_b, _SUBLANE_BF16))

    # On multi-TC parts, give each core at least one step when the batch allows.
    if num_cores > 1 and B >= _SUBLANE_BF16 * num_cores:
        if pl.cdiv(B, tile_b) < num_cores:
            tile_b = max(_SUBLANE_BF16,
                         _round_up(pl.cdiv(B, num_cores), _SUBLANE_BF16))

    grid_b = pl.cdiv(B, tile_b)  # trailing ragged block handled by Pallas

    # ---- cost estimate (helps XLA schedule around the custom call) ----------
    flops = 2 * B * (in_f * hid + hid * hid + hid * lat)
    bytes_accessed = (B * in_f * x_itemsize + B * lat * x_itemsize
                      + w_itemsize * (in_f * hid + hid * hid + hid * lat)
                      + 4 * (2 * hid + lat))
    cost = pl.CostEstimate(flops=flops, transcendentals=0,
                           bytes_accessed=bytes_accessed)

    # Constant index_map: each weight/bias is fetched into VMEM once and reused
    # across all grid steps.
    const = lambda r, c: pl.BlockSpec((r, c), lambda i: (0, 0))

    out = pl.pallas_call(
        _mlp_kernel,
        out_shape=jax.ShapeDtypeStruct((B, lat), x.dtype),
        grid_spec=pltpu.PrefetchScalarGridSpec(
            num_scalar_prefetch=0,
            grid=(grid_b,),
            in_specs=[
                pl.BlockSpec((tile_b, in_f), lambda i: (i, 0)),  # x tile
                const(in_f, hid),   # w1
                const(1, hid),      # b1 (f32)
                const(hid, hid),    # w2
                const(1, hid),      # b2 (f32)
                const(hid, lat),    # w3
                const(1, lat),      # b3 (f32)
            ],
            out_specs=pl.BlockSpec((tile_b, lat), lambda i: (i, 0)),
        ),
        compiler_params=pltpu.CompilerParams(
            dimension_semantics=("parallel",),
            vmem_limit_bytes=vmem_limit,
        ),
        cost_estimate=cost,
    )(x, w1c, b1, w2c, b2, w3c, b3)
    return out


def _init_linear(key, fan_in, fan_out, dtype=jnp.float32):
    # Deterministic init mimicking PyTorch's default U(-1/sqrt(fan_in), +1/sqrt(fan_in)).
    kw, kb = jax.random.split(key)
    bound = 1.0 / jnp.sqrt(jnp.asarray(fan_in, dtype))
    w = jax.random.uniform(kw, (fan_in, fan_out), dtype, -bound, bound)
    b = jax.random.uniform(kb, (1, fan_out), dtype, -bound, bound)
    return w, b


def _reference_mlp(x, w1, b1, w2, b2, w3, b3):
    h = jnp.maximum(x @ w1 + b1, 0.0)
    h = jnp.maximum(h @ w2 + b2, 0.0)
    return h @ w3 + b3


if __name__ == "__main__":
    # Small shapes consistent with the module: in_feature=64, hidden=128, latent=32.
    in_feature, hidden, latent = 64, 128, 32

    key = jax.random.PRNGKey(0)
    kx, k1, k2, k3, kx2 = jax.random.split(key, 5)

    w1, b1 = _init_linear(k1, in_feature, hidden)
    w2, b2 = _init_linear(k2, hidden, hidden)
    w3, b3 = _init_linear(k3, hidden, latent)

    # Case 1: B=16, exact f32 path vs reference (tight tolerance).
    B1 = 16
    x1 = jax.random.normal(kx, (B1, in_feature), jnp.float32)
    ref1 = _reference_mlp(x1, w1, b1, w2, b2, w3, b3)
    out_f32 = jax.block_until_ready(
        visual_goal_encoder(x1, w1, b1, w2, b2, w3, b3, use_bf16=False))
    assert out_f32.shape == (B1, latent)
    assert jnp.allclose(out_f32, ref1, atol=1e-5, rtol=1e-5), "f32 path mismatch"

    # Case 1b: default fast path (bf16 matmuls, f32 accumulation) — loose tolerance.
    out_bf16 = jax.block_until_ready(
        visual_goal_encoder(x1, w1, b1, w2, b2, w3, b3))
    assert out_bf16.shape == (B1, latent)
    assert jnp.allclose(out_bf16, ref1, atol=5e-2, rtol=5e-2), "bf16 path mismatch"

    # Case 2: B=10 (not a multiple of the tile/sublanes) — exercises the
    # ragged trailing-block path (no wrapper pad/slice anymore).
    B2 = 10
    x2 = jax.random.normal(kx2, (B2, in_feature), jnp.float32)
    ref2 = _reference_mlp(x2, w1, b1, w2, b2, w3, b3)
    out2 = jax.block_until_ready(
        visual_goal_encoder(x2, w1, b1, w2, b2, w3, b3, use_bf16=False))
    assert out2.shape == (B2, latent)
    assert jnp.allclose(out2, ref2, atol=1e-5, rtol=1e-5), "ragged-batch mismatch"

    print("KERNEL_OK")
</pallas_src>

<mosaic_0001>
module attributes {stable_mosaic.version = 11 : i64} {
  func.func @_mlp_kernel(%arg0: i32, %arg1: memref<16x64xf32, #tpu.memory_space<vmem>>, %arg2: memref<64x128xf32, #tpu.memory_space<vmem>>, %arg3: memref<1x128xf32, #tpu.memory_space<vmem>>, %arg4: memref<128x128xf32, #tpu.memory_space<vmem>>, %arg5: memref<1x128xf32, #tpu.memory_space<vmem>>, %arg6: memref<128x32xf32, #tpu.memory_space<vmem>>, %arg7: memref<1x32xf32, #tpu.memory_space<vmem>>, %arg8: memref<16x32xf32, #tpu.memory_space<vmem>>) attributes {dimension_semantics = [#tpu.dimension_semantics<parallel>], iteration_bounds = array<i64: 1>, scalar_prefetch = 0 : i64, scratch_operands = 0 : i64, tpu.core_type = #tpu.core_type<tc>, window_params = [{transform_indices = @transform_0, window_bounds = array<i64: 16, 64>}, {pipeline_mode = #tpu.pipeline_mode<synchronous>, transform_indices = @transform_1, window_bounds = array<i64: 64, 128>}, {pipeline_mode = #tpu.pipeline_mode<synchronous>, transform_indices = @transform_2, window_bounds = array<i64: 1, 128>}, {pipeline_mode = #tpu.pipeline_mode<synchronous>, transform_indices = @transform_3, window_bounds = array<i64: 128, 128>}, {pipeline_mode = #tpu.pipeline_mode<synchronous>, transform_indices = @transform_4, window_bounds = array<i64: 1, 128>}, {pipeline_mode = #tpu.pipeline_mode<synchronous>, transform_indices = @transform_5, window_bounds = array<i64: 128, 32>}, {pipeline_mode = #tpu.pipeline_mode<synchronous>, transform_indices = @transform_6, window_bounds = array<i64: 1, 32>}, {transform_indices = @transform_7, window_bounds = array<i64: 16, 32>}]} {
    %c0 = arith.constant 0 : index
    %c0_0 = arith.constant 0 : index
    %0 = vector.load %arg1[%c0, %c0_0] : memref<16x64xf32, #tpu.memory_space<vmem>>, vector<16x64xf32>
    %c0_1 = arith.constant 0 : index
    %c0_2 = arith.constant 0 : index
    %1 = vector.load %arg2[%c0_1, %c0_2] : memref<64x128xf32, #tpu.memory_space<vmem>>, vector<64x128xf32>
    %cst = arith.constant dense<0.000000e+00> : vector<16x128xf32>
    %2 = tpu.matmul %0, %1, %cst {dimension_numbers = #tpu.dot_dimension_numbers<[1], [0], [0], [1], [0, 0, 1, 1], [], []>} : vector<16x64xf32>, vector<64x128xf32>, vector<16x128xf32> -> vector<16x128xf32>
    %c0_3 = arith.constant 0 : index
    %c0_4 = arith.constant 0 : index
    %3 = vector.load %arg3[%c0_3, %c0_4] : memref<1x128xf32, #tpu.memory_space<vmem>>, vector<1x128xf32>
    %4 = vector.broadcast %3 : vector<1x128xf32> to vector<16x128xf32>
    %5 = arith.addf %2, %4 : vector<16x128xf32>
    %cst_5 = arith.constant 0.000000e+00 : f32
    %6 = vector.broadcast %cst_5 : f32 to vector<16x128xf32>
    %7 = arith.maximumf %5, %6 : vector<16x128xf32>
    %c0_6 = arith.constant 0 : index
    %c0_7 = arith.constant 0 : index
    %8 = vector.load %arg4[%c0_6, %c0_7] : memref<128x128xf32, #tpu.memory_space<vmem>>, vector<128x128xf32>
    %cst_8 = arith.constant dense<0.000000e+00> : vector<16x128xf32>
    %9 = tpu.matmul %7, %8, %cst_8 {dimension_numbers = #tpu.dot_dimension_numbers<[1], [0], [0], [1], [0, 0, 1, 1], [], []>} : vector<16x128xf32>, vector<128x128xf32>, vector<16x128xf32> -> vector<16x128xf32>
    %c0_9 = arith.constant 0 : index
    %c0_10 = arith.constant 0 : index
    %10 = vector.load %arg5[%c0_9, %c0_10] : memref<1x128xf32, #tpu.memory_space<vmem>>, vector<1x128xf32>
    %11 = vector.broadcast %10 : vector<1x128xf32> to vector<16x128xf32>
    %12 = arith.addf %9, %11 : vector<16x128xf32>
    %cst_11 = arith.constant 0.000000e+00 : f32
    %13 = vector.broadcast %cst_11 : f32 to vector<16x128xf32>
    %14 = arith.maximumf %12, %13 : vector<16x128xf32>
    %c0_12 = arith.constant 0 : index
    %c0_13 = arith.constant 0 : index
    %15 = vector.load %arg6[%c0_12, %c0_13] : memref<128x32xf32, #tpu.memory_space<vmem>>, vector<128x32xf32>
    %cst_14 = arith.constant dense<0.000000e+00> : vector<16x32xf32>
    %16 = tpu.matmul %14, %15, %cst_14 {dimension_numbers = #tpu.dot_dimension_numbers<[1], [0], [0], [1], [0, 0, 1, 1], [], []>} : vector<16x128xf32>, vector<128x32xf32>, vector<16x32xf32> -> vector<16x32xf32>
    %c0_15 = arith.constant 0 : index
    %c0_16 = arith.constant 0 : index
    %17 = vector.load %arg7[%c0_15, %c0_16] : memref<1x32xf32, #tpu.memory_space<vmem>>, vector<1x32xf32>
    %18 = vector.broadcast %17 : vector<1x32xf32> to vector<16x32xf32>
    %19 = arith.addf %16, %18 : vector<16x32xf32>
    %c0_17 = arith.constant 0 : index
    %c0_18 = arith.constant 0 : index
    %20 = vector.load %arg8[%c0_17, %c0_18] : memref<16x32xf32, #tpu.memory_space<vmem>>, vector<16x32xf32>
    tpu.vector_store %arg8[%c0_17, %c0_18], %19 {strides = array<i32>} : memref<16x32xf32, #tpu.memory_space<vmem>>, vector<16x32xf32>,
    return
  }
  func.func @transform_0(%arg0: i32) -> (i32, i32) {
    %c0_i32 = arith.constant 0 : i32
    %c0_i32_0 = arith.constant 0 : i32
    return %arg0, %c0_i32 : i32, i32
  }
  func.func @transform_1(%arg0: i32) -> (i32, i32) {
    %c0_i32 = arith.constant 0 : i32
    %c0_i32_0 = arith.constant 0 : i32
    %c0_i32_1 = arith.constant 0 : i32
    return %c0_i32, %c0_i32_0 : i32, i32
  }
  func.func @transform_2(%arg0: i32) -> (i32, i32) {
    %c0_i32 = arith.constant 0 : i32
    %c0_i32_0 = arith.constant 0 : i32
    %c0_i32_1 = arith.constant 0 : i32
    return %c0_i32, %c0_i32_0 : i32, i32
  }
  func.func @transform_3(%arg0: i32) -> (i32, i32) {
    %c0_i32 = arith.constant 0 : i32
    %c0_i32_0 = arith.constant 0 : i32
    %c0_i32_1 = arith.constant 0 : i32
    return %c0_i32, %c0_i32_0 : i32, i32
  }
  func.func @transform_4(%arg0: i32) -> (i32, i32) {
    %c0_i32 = arith.constant 0 : i32
    %c0_i32_0 = arith.constant 0 : i32
    %c0_i32_1 = arith.constant 0 : i32
    return %c0_i32, %c0_i32_0 : i32, i32
  }
  func.func @transform_5(%arg0: i32) -> (i32, i32) {
    %c0_i32 = arith.constant 0 : i32
    %c0_i32_0 = arith.constant 0 : i32
    %c0_i32_1 = arith.constant 0 : i32
    return %c0_i32, %c0_i32_0 : i32, i32
  }
  func.func @transform_6(%arg0: i32) -> (i32, i32) {
    %c0_i32 = arith.constant 0 : i32
    %c0_i32_0 = arith.constant 0 : i32
    %c0_i32_1 = arith.constant 0 : i32
    return %c0_i32, %c0_i32_0 : i32, i32
  }
  func.func @transform_7(%arg0: i32) -> (i32, i32) {
    %c0_i32 = arith.constant 0 : i32
    %c0_i32_0 = arith.constant 0 : i32
    return %arg0, %c0_i32 : i32, i32
  }
}

</mosaic_0001>

<bundles_post_ra>
// kernel: visual_goal_encoder.1
= control target key start
LH: loop header
LB: loop body
LE: loop exit
PB: predicated region body
PF: predicated region fallthrough
CT: control target
= control target key end

     0   :  { %12 = vsyncpa [#allocation3], 0  ;;  %s445_s0 = inlined_call_operand.vmem [shape: f32[16,64], index: 0, kind: input, shape index: {}]   ;;  %s446_s1 = inlined_call_operand.hbm [shape: f32[64,128], index: 1, kind: input, shape index: {}]   ;;  %s447_s2 = inlined_call_operand.vmem [shape: f32[1,128], index: 2, kind: input, shape index: {}]   ;;  %s448_s3 = inlined_call_operand.vmem [shape: f32[128,128], index: 3, kind: input, shape index: {}]   ;;  %s449_s4 = inlined_call_operand.vmem [shape: f32[1,128], index: 4, kind: input, shape index: {}]   ;;  %s450_s5 = inlined_call_operand.vmem [shape: f32[128,32], index: 5, kind: input, shape index: {}]   ;;  %s451_s6 = inlined_call_operand.vmem [shape: f32[1,32], index: 6, kind: input, shape index: {}]   ;;  %s452_s7 = inlined_call_operand.hbm [shape: f32[16,32], index: 7, kind: output, shape index: {}]  }
   0x1   :  { %13 = vsyncpa [#allocation4], 0  ;;  %s20_s26 = sshll.u32 %s446_s1, 4  ;;  %s276_s27 = smov [#allocation2]   ;;  %s21_s26 = int_to_ptr.hbm [resolvable:$true] %s20_s26 }
   0x2   :  { %s22_s28 = sshll.u32 %s276_s27, 4  ;;  %s277_s29 = smov 128   ;;  %s23_s28 = int_to_ptr.vmem [resolvable:$true] %s22_s28 }
   0x3   :  { %s278_s30 = smov 8  }
   0x4   :  { %28 = dma.hbm_to_vmem [thread:$0]  %s21_s26, 1024, %s23_s28, [#allocation3], %s277_s29, %s277_s29, %s278_s30  }
   0x5   :  { %272 = dma.done.wait [#allocation3], 1024  }
   0x6   :  { %273 = vsyncadd [#allocation3], 4294966272  ;;  %v52_v0 = vld [vmem:[#allocation2 + $0x38] sm:$0xff]  ;;  %v51_v1 = vld [vmem:[#allocation2 + $0x30] sm:$0xff]  ;;  %vm57_vm0 = vcmask 523264   ;;  %vm177_vm1 = vcmask 261120  }
   0x7   :  { %72 = vmatpush.msra.mxu0 %v52_v0  ;;  %v50_v2 = vld [vmem:[#allocation2 + $0x28] sm:$0xff]  ;;  %v104_v3 = vld [vmem:[%s448_s3 + $0x78] sm:$0xff]  ;;  %v103_v4 = vld [vmem:[%s448_s3 + $0x70] sm:$0xff]  ;;  %s186_s12 = sshll.u32 %s452_s7, 4  ;;  %s187_s12 = int_to_ptr.hbm [resolvable:$true] %s186_s12 }
   0x8   :  { %v49_v5 = vld [vmem:[#allocation2 + $0x20] sm:$0xff]  ;;  %109 = vmatpush.msra.mxu1 %v104_v3  ;;  %201 = vmatpush.msra.mxu3 %v104_v3  ;;  %v102_v6 = vld [vmem:[%s448_s3 + $0x68] sm:$0xff]  ;;  %v48_v7 = vld [vmem:[#allocation2 + $0x18] sm:$0xff] }
   0x9   :  { %73 = vmatpush.msra.mxu0 %v51_v1  ;;  %v101_v8 = vld [vmem:[%s448_s3 + $0x60] sm:$0xff]  ;;  %v47_v9 = vld [vmem:[#allocation2 + $0x10] sm:$0xff]  ;;  %v100_v10 = vld [vmem:[%s448_s3 + $0x58] sm:$0xff] }
   0xa   :  { %110 = vmatpush.msra.mxu1 %v103_v4  ;;  %202 = vmatpush.msra.mxu3 %v103_v4  ;;  %v46_v11 = vld [vmem:[#allocation2 + $0x8] sm:$0xff]  ;;  %v99_v12 = vld [vmem:[%s448_s3 + $0x50] sm:$0xff]  ;;  %v45_v13 = vld [vmem:[#allocation2] sm:$0xff] }
   0xb   :  { %74 = vmatpush.msra.mxu0 %v50_v2  ;;  %v43_v14 = vld [vmem:[%s445_s0] sm:$0xff]  ;;  %v98_v15 = vld [vmem:[%s448_s3 + $0x48] sm:$0xff]  ;;  %v96_v17 = vld [vmem:[%s448_s3 + $0x38] sm:$0xff] }
   0xc   :  { %111 = vmatpush.msra.mxu1 %v102_v6  ;;  %203 = vmatpush.msra.mxu3 %v102_v6  ;;  %v97_v16 = vld [vmem:[%s448_s3 + $0x40] sm:$0xff]  ;;  %v95_v18 = vld [vmem:[%s448_s3 + $0x30] sm:$0xff]  ;;  %v44_v19 = vld [vmem:[%s445_s0 + $0x8] sm:$0xff] }
   0xd   :  { %75 = vmatpush.msra.mxu0 %v49_v5  ;;  %v94_v20 = vld [vmem:[%s448_s3 + $0x28] sm:$0xff]  ;;  %v93_v21 = vld [vmem:[%s448_s3 + $0x20] sm:$0xff]  ;;  %v92_v22 = vld [vmem:[%s448_s3 + $0x18] sm:$0xff] }
   0xe   :  { %112 = vmatpush.msra.mxu1 %v101_v8  ;;  %204 = vmatpush.msra.mxu3 %v101_v8  ;;  %v91_v23 = vld [vmem:[%s448_s3 + $0x10] sm:$0xff]  ;;  %v90_v24 = vld [vmem:[%s448_s3 + $0x8] sm:$0xff]  ;;  %v89_v25 = vld [vmem:[%s448_s3] sm:$0xff] }
   0xf   :  { %76 = vmatpush.msra.mxu0 %v48_v7  ;;  %v149_v26 = vld [vmem:[%s450_s5 + $0x78] sm:$0xff]  ;;  %v148_v27 = vld [vmem:[%s450_s5 + $0x70] sm:$0xff]  ;;  %v147_v28 = vld [vmem:[%s450_s5 + $0x68] sm:$0xff] }
  0x10   :  { %113 = vmatpush.msra.mxu1 %v100_v10  ;;  %205 = vmatpush.msra.mxu3 %v100_v10  ;;  %v146_v29 = vld [vmem:[%s450_s5 + $0x60] sm:$0xff]  ;;  %v145_v30 = vld [vmem:[%s450_s5 + $0x58] sm:$0xff]  ;;  %v144_v31 = vld [vmem:[%s450_s5 + $0x50] sm:$0xff] }
  0x11   :  { %77 = vmatpush.msra.mxu0 %v47_v9  ;;  %154 = vmatpush.msra.mxu2 %v149_v26  ;;  %v143_v32 = vld [vmem:[%s450_s5 + $0x48] sm:$0xff]  ;;  %v142_v33 = vld [vmem:[%s450_s5 + $0x40] sm:$0xff]  ;;  %v141_v34 = vld [vmem:[%s450_s5 + $0x38] sm:$0xff] }
  0x12   :  { %114 = vmatpush.msra.mxu1 %v99_v12  ;;  %206 = vmatpush.msra.mxu3 %v99_v12  ;;  %v221_v35 = vld [vmem:[%s447_s2] ss:$0 sm:$0xff]  ;;  %v140_v36 = vld [vmem:[%s450_s5 + $0x30] sm:$0xff]  ;;  %v139_v37 = vld [vmem:[%s450_s5 + $0x28] sm:$0xff] }
  0x13   :  { %78 = vmatpush.msra.mxu0 %v46_v11  ;;  %155 = vmatpush.msra.mxu2 %v148_v27  ;;  %v138_v40 = vld [vmem:[%s450_s5 + $0x20] sm:$0xff]  ;;  %v137_v42 = vld [vmem:[%s450_s5 + $0x18] sm:$0xff]  ;;  %v136_v46 = vld [vmem:[%s450_s5 + $0x10] sm:$0xff] }
  0x14   :  { %115 = vmatpush.msra.mxu1 %v98_v15  ;;  %207 = vmatpush.msra.mxu3 %v98_v15  ;;  %v135_v47 = vld [vmem:[%s450_s5 + $0x8] sm:$0xff]  ;;  %v134_v48 = vld [vmem:[%s450_s5] sm:$0xff]  ;;  %s279_s5 = smov [#allocation5]  }
  0x15   :  { %79 = vmatpush.msra.mxu0 %v45_v13  ;;  %156 = vmatpush.msra.mxu2 %v147_v28  ;;  %v222_v49 = vld [vmem:[%s449_s4] ss:$0 sm:$0xff]  ;;  %s184_s10 = sshll.u32 %s279_s5, 4  ;;  %s185_s10 = int_to_ptr.vmem [resolvable:$true] %s184_s10 }
  0x16   :  { %199 = vmatmul.msk.f32.vlgmr.msra.gmra.mxu0 %vm57_vm0, %v43_v14  ;;  %116 = vmatpush.msra.mxu1 %v97_v16  ;;  %v223_v56 = vld [vmem:[%s451_s6] ss:$0 sm:$0xff] }
  0x17   :  { %208 = vmatpush.msra.mxu3 %v97_v16  ;;  %157 = vmatpush.msra.mxu2 %v146_v29 }
  0x18   :  { %117 = vmatpush.msra.mxu1 %v96_v17 }
  0x19   :  { %209 = vmatpush.msra.mxu3 %v96_v17  ;;  %158 = vmatpush.msra.mxu2 %v145_v30 }
  0x1a   :  { %118 = vmatpush.msra.mxu1 %v95_v18 }
  0x1b   :  { %210 = vmatpush.msra.mxu3 %v95_v18  ;;  %159 = vmatpush.msra.mxu2 %v144_v31 }
  0x1c   :  { %119 = vmatpush.msra.mxu1 %v94_v20 }
  0x1d   :  { %211 = vmatpush.msra.mxu3 %v94_v20  ;;  %160 = vmatpush.msra.mxu2 %v143_v32 }
  0x1e   :  { %200 = vmatmul.msk.f32.gmra.mxu0 %vm57_vm0, %v44_v19  ;;  %120 = vmatpush.msra.mxu1 %v93_v21 }
  0x1f   :  { %212 = vmatpush.msra.mxu3 %v93_v21  ;;  %161 = vmatpush.msra.mxu2 %v142_v33 }
  0x20   :  { %121 = vmatpush.msra.mxu1 %v92_v22 }
  0x21   :  { %213 = vmatpush.msra.mxu3 %v92_v22  ;;  %162 = vmatpush.msra.mxu2 %v141_v34 }
  0x22   :  { %122 = vmatpush.msra.mxu1 %v91_v23 }
  0x23   :  { %214 = vmatpush.msra.mxu3 %v91_v23  ;;  %163 = vmatpush.msra.mxu2 %v140_v36 }
  0x24   :  { %123 = vmatpush.msra.mxu1 %v90_v24 }
  0x25   :  { %215 = vmatpush.msra.mxu3 %v90_v24  ;;  %164 = vmatpush.msra.mxu2 %v139_v37 }
  0x26   :  { %124 = vmatpush.msra.mxu1 %v89_v25 }
  0x27   :  { %216 = vmatpush.msra.mxu3 %v89_v25  ;;  %165 = vmatpush.msra.mxu2 %v138_v40 }
  0x29   :  { %166 = vmatpush.msra.mxu2 %v137_v42 }
  0x2b   :  { %167 = vmatpush.msra.mxu2 %v136_v46 }
  0x2d   :  { %168 = vmatpush.msra.mxu2 %v135_v47 }
  0x2f   :  { %169 = vmatpush.msra.mxu2 %v134_v48 }
  0x93   :  { %v81_v38 = vpop.f32.mrf.mxu0 }
  0x94   :  { %v82_v39 = vadd.f32 %v221_v35, %v81_v38 }
  0x96   :  { %v87_v41 = vmax.f32 %v82_v39, 0.0 }
  0x98   :  { %125 = vmatmul.f32.vlgmr.msra.gmra.mxu1 %v87_v41 }
  0x9b   :  { %v84_v43 = vpop.f32.mrf.mxu0 }
  0x9c   :  { %v85_v44 = vadd.f32 %v221_v35, %v84_v43 }
  0x9e   :  { %v88_v45 = vmax.f32 %v85_v44, 0.0 }
  0xa0   :  { %128 = vmatmul.f32.vlgmr.msra.gmra.mxu3 %v88_v45 }
 0x115   :  { %v126_v50 = vpop.f32.mrf.mxu1 }
 0x116   :  { %v127_v51 = vadd.f32 %v222_v49, %v126_v50 }
 0x118   :  { %v132_v52 = vmax.f32 %v127_v51, 0.0 }
 0x11a   :  { %170 = vmatmul.f32.vlgmr.msra.gmra.mxu2 %v132_v52 }
 0x123   :  { %v129_v53 = vpop.f32.mrf.mxu3 }
 0x124   :  { %v130_v54 = vadd.f32 %v222_v49, %v129_v53 }
 0x126   :  { %v133_v55 = vmax.f32 %v130_v54, 0.0 }
 0x128   :  { %173 = vmatmul.f32.gmra.mxu2 %v133_v55 }
 0x19d   :  { %v171_v57 = vpop.f32.mrf.mxu2 }
 0x19e   :  { %v172_v58 = vadd.f32 %v223_v56, %v171_v57 }
 0x1a0   :  { %178 = vst.msk [vmem:[#allocation5] sm:$0xff] %vm177_vm1, %v172_v58 }
 0x1ab   :  { %v174_v59 = vpop.f32.mrf.mxu2 }
 0x1ac   :  { %v175_v60 = vadd.f32 %v223_v56, %v174_v59 }
 0x1ae   :  { %179 = vst.msk [vmem:[#allocation5 + $0x8] sm:$0xff] %vm177_vm1, %v175_v60 }
 0x1af   :  { %192 = dma.vmem_to_hbm [thread:$0]  %s185_s10, 256, %s187_s12, [#allocation4], %s277_s29, %s277_s29, %s278_s30  }
 0x1b0   :  { %274 = dma.done.wait [#allocation4], 256  }
 0x1b1   :  { %275 = vsyncadd [#allocation4], 4294967040 }
 0x1b2   :  { %197 = vsyncpa [#allocation3], 1 }
 0x1b3   :  { %198 = vsyncpa [#allocation4], 1 }

</bundles_post_ra>
